<compile_context>
chip_gen: v5e
topology: v5e:2x2
jax: 0.10.0
libtpu: 0.0.40
codegen_flags: <defaults>
</compile_context>

<pallas_src>
import functools

import jax
import jax.numpy as jnp
from jax.experimental import pallas as pl
from jax.experimental.pallas import tpu as pltpu

EPS = 1e-5          # InstanceNorm1d default eps
NEG_SLOPE = 0.01    # nn.LeakyReLU default negative_slope


def _round_up(x, m):
    return ((x + m - 1) // m) * m


def _pad_to(a, shape):
    pads = [(0, s - d) for d, s in zip(a.shape, shape)]
    if all(p == (0, 0) for p in pads):
        return a                                   # avoid a no-op copy
    return jnp.pad(a, pads)


def _layout_bytes(shape, dtype):
    """Bytes an array occupies in VMEM after (sublane, lane) layout padding."""
    itemsize = jnp.dtype(dtype).itemsize
    sub = {4: 8, 2: 16, 1: 32}.get(itemsize, 8)
    if len(shape) == 0:
        return itemsize
    if len(shape) == 1:
        return _round_up(int(shape[0]), 128) * itemsize
    lead = 1
    for d in shape[:-2]:
        lead *= int(d)
    return (lead * _round_up(int(shape[-2]), sub)
            * _round_up(int(shape[-1]), 128) * itemsize)


def _physical_vmem_bytes():
    try:
        return int(pltpu.get_tpu_info().vmem_capacity_bytes)
    except Exception:
        return 64 * 1024 * 1024                    # conservative (v7x per-TC)


# ---------------------------------------------------------------------------
# Fused kernel for one batch tile:
#   (pool folded into W_fold) + view Linear -> norm/act ->
#   residual hidden blocks -> output Linear -> norm
# ---------------------------------------------------------------------------
def _head_mlp_kernel(img_ref, view_ref, w_fold_ref, w_in_view_ref, b_in_ref,
                     w_hid_ref, b_hid_ref, w_out_ref, b_out_ref,
                     out_ref, *, hid, num_hidden):
    HIDp = out_ref.shape[1]            # hidden width padded to 128 lanes
    mm_dtype = w_fold_ref.dtype        # matmul operand dtype (bf16 or f32)

    # ---- InstanceNorm1d on (B, F): per row, biased var, masked to the real
    #      hidden width (padded lanes carry garbage but never feed back in) --
    col = jax.lax.broadcasted_iota(jnp.int32, (1, HIDp), 1)
    valid = (col < hid).astype(jnp.float32)
    inv_n = 1.0 / float(hid)

    def rownorm(v):
        mu = jnp.sum(v * valid, axis=-1, keepdims=True) * inv_n
        vc = v - mu
        vcm = vc * valid
        var = jnp.sum(vcm * vcm, axis=-1, keepdims=True) * inv_n
        return vc * jax.lax.rsqrt(var + EPS)

    def lrelu(v):
        return jnp.where(v > 0, v, NEG_SLOPE * v)

    # ---- input layer: pooling is folded into w_fold (single dense MXU
    #      matmul over the flat image); the view concat is a second matmul ---
    h = (jnp.dot(img_ref[...], w_fold_ref[...],
                 preferred_element_type=jnp.float32)
         + jnp.dot(view_ref[...], w_in_view_ref[...],
                   preferred_element_type=jnp.float32)
         + b_in_ref[...])
    h = lrelu(rownorm(h))

    # ---- residual hidden blocks (static unroll; num_layers-2 is small) -----
    for i in range(num_hidden):
        res = h
        z = (jnp.dot(h.astype(mm_dtype), w_hid_ref[i],
                     preferred_element_type=jnp.float32)
             + b_hid_ref[i])
        h = lrelu(rownorm(z)) + res

    # ---- output layer + final InstanceNorm (no output activation) ----------
    z = (jnp.dot(h.astype(mm_dtype), w_out_ref[...],
                 preferred_element_type=jnp.float32)
         + b_out_ref[...])
    out_ref[...] = rownorm(z)


# ---------------------------------------------------------------------------
# Wrapper: pooling fold / padding / tiling / BlockSpecs.
# ---------------------------------------------------------------------------
def head_mlp_forward(image, view_information, params, *, pool_size, num_layers,
                     matmul_dtype=jnp.bfloat16):
    B, C, H, W = image.shape
    P = pool_size
    # TODO(synk): general (non-divisible) adaptive_avg_pool2d windows not implemented.
    assert H % P == 0 and W % P == 0, "kernel assumes evenly divisible pooling"
    bh, bw = H // P, W // P
    F_img = C * P * P
    CHW = C * H * W
    HID = params["w_out"].shape[1]
    num_hidden = num_layers - 2
    mm_dtype = jnp.dtype(matmul_dtype)

    # --- tiling: large batch tile for MXU M-occupancy; keep >=2 grid steps
    #     when the batch allows it (v7x dual-TensorCore sharding); shrink only
    #     if the per-step image tile would get too big for VMEM ------------- 
    g = 8 if mm_dtype.itemsize == 4 else 16        # sublane granule of img dtype
    CHWp = _round_up(CHW, 128)                     # lane-dense flat image width
    HIDp = _round_up(HID, 128)                     # lane-dense hidden width
    Bg = _round_up(B, g)
    TB = min(128, Bg)
    if Bg // TB < 2 and Bg > g:                    # expose >=2 parallel steps
        TB = _round_up(pl.cdiv(Bg, 2), g)
    while TB > g and _layout_bytes((TB, CHWp), mm_dtype) > (4 << 20):
        TB = max(g, _round_up(TB // 2, g))
    Bp = _round_up(B, TB)
    grid = Bp // TB

    # --- split w_in into image / view parts; fold the pooling operator into
    #     the image part: W_fold[c*H*W + h*W + w, :] = w_in[f(c,h,w), :]/(bh*bw)
    w_in = params["w_in"].astype(jnp.float32)
    w_in_img = w_in[:F_img]
    if view_information is not None:
        view = view_information.reshape(B, -1).astype(jnp.float32)
        V = view.shape[1]
        w_in_view = w_in[F_img:F_img + V]
    else:
        V = 8
        view = jnp.zeros((B, V), jnp.float32)
        w_in_view = jnp.zeros((V, HID), jnp.float32)

    feat_idx = (jnp.arange(C)[:, None, None] * (P * P)
                + (jnp.arange(H) // bh)[None, :, None] * P
                + (jnp.arange(W) // bw)[None, None, :]).reshape(-1)   # (CHW,)
    w_fold = jnp.take(w_in_img, feat_idx, axis=0) / float(bh * bw)    # (CHW, HID)

    nh = max(num_hidden, 1)
    if num_hidden > 0:
        w_hid = params["w_hid"].astype(jnp.float32)
        b_hid = params["b_hid"].reshape(num_hidden, 1, HID).astype(jnp.float32)
    else:                                # dummy, never read by the kernel loop
        w_hid = jnp.zeros((1, HID, HID), jnp.float32)
        b_hid = jnp.zeros((1, 1, HID), jnp.float32)

    # --- flatten/cast/pad (all padding is ZEROS -> padded K rows of every
    #     weight are zero; see invariant at top).  Flatten is a free reshape;
    #     the only full-image pass is the cast to matmul_dtype (halves HBM
    #     bytes when bf16); pads are skipped when already aligned. -----------
    img_flat = image.reshape(B, CHW)
    if img_flat.dtype != mm_dtype:
        img_flat = img_flat.astype(mm_dtype)
    img_p       = _pad_to(img_flat, (Bp, CHWp))
    view_p      = _pad_to(view.astype(mm_dtype), (Bp, V))
    w_fold_p    = _pad_to(w_fold, (CHWp, HIDp)).astype(mm_dtype)
    w_in_view_p = _pad_to(w_in_view, (V, HIDp)).astype(mm_dtype)
    b_in_p      = _pad_to(params["b_in"].reshape(1, HID).astype(jnp.float32), (1, HIDp))
    w_hid_p     = _pad_to(w_hid, (nh, HIDp, HIDp)).astype(mm_dtype)
    b_hid_p     = _pad_to(b_hid, (nh, 1, HIDp))
    w_out_p     = _pad_to(params["w_out"].astype(jnp.float32), (HIDp, HIDp)).astype(mm_dtype)
    b_out_p     = _pad_to(params["b_out"].reshape(1, HID).astype(jnp.float32), (1, HIDp))

    # --- VMEM budget from layout-padded sizes: default pipelining
    #     double-buffers every operand (incl. constant-index weights); ~25%
    #     headroom for Mosaic scratch / live intermediates; generation-aware
    #     cap (~96 MiB on v5e/v6e, ~48 MiB on v7x). ---------------------------
    tile_bytes = (_layout_bytes((TB, CHWp), mm_dtype)
                  + _layout_bytes((TB, V), mm_dtype)
                  + _layout_bytes((TB, HIDp), jnp.float32))
    const_bytes = sum(_layout_bytes(a.shape, a.dtype) for a in
                      (w_fold_p, w_in_view_p, b_in_p, w_hid_p, b_hid_p,
                       w_out_p, b_out_p))
    need = int(1.25 * 2 * (tile_bytes + const_bytes)) + (2 << 20)
    cap = int(0.75 * _physical_vmem_bytes())
    vmem_limit = max(4 << 20, min(need, cap))
    # Note: if num_hidden*HIDp^2 ever grows large, mark the weight BlockSpecs
    # pipeline_mode=pl.Buffered(1) or grid over the layer axis; unnecessary
    # at the <1 MiB weight stack here.

    out_p = pl.pallas_call(
        functools.partial(_head_mlp_kernel, hid=HID, num_hidden=num_hidden),
        out_shape=jax.ShapeDtypeStruct((Bp, HIDp), jnp.float32),
        grid=(grid,),
        in_specs=[
            pl.BlockSpec((TB, CHWp), lambda i: (i, 0)),            # flat image tile
            pl.BlockSpec((TB, V), lambda i: (i, 0)),               # view tile
            pl.BlockSpec((CHWp, HIDp), lambda i: (0, 0)),          # folded pool+w_in
            pl.BlockSpec((V, HIDp), lambda i: (0, 0)),             # w_in (view part)
            pl.BlockSpec((1, HIDp), lambda i: (0, 0)),             # b_in
            pl.BlockSpec((nh, HIDp, HIDp), lambda i: (0, 0, 0)),   # w_hid stack
            pl.BlockSpec((nh, 1, HIDp), lambda i: (0, 0, 0)),      # b_hid stack
            pl.BlockSpec((HIDp, HIDp), lambda i: (0, 0)),          # w_out
            pl.BlockSpec((1, HIDp), lambda i: (0, 0)),             # b_out
        ],
        out_specs=pl.BlockSpec((TB, HIDp), lambda i: (i, 0)),      # lane-dense
        compiler_params=pltpu.CompilerParams(
            dimension_semantics=("parallel",),
            vmem_limit_bytes=vmem_limit),
    )(img_p, view_p, w_fold_p, w_in_view_p, b_in_p,
      w_hid_p, b_hid_p, w_out_p, b_out_p)

    return out_p[:B, :HID]


# ---------------------------------------------------------------------------
# Pure-JAX reference of the same forward pass (for correctness check).
# ---------------------------------------------------------------------------
def head_mlp_reference(image, view_information, params, *, pool_size, num_layers):
    B, C, H, W = image.shape
    P = pool_size
    pooled = image.reshape(B, C, P, H // P, P, W // P).mean(axis=(3, 5))
    feats = pooled.reshape(B, -1)
    if view_information is not None:
        feats = jnp.concatenate([feats, view_information.reshape(B, -1)], axis=1)

    def rownorm(v):
        mu = v.mean(-1, keepdims=True)
        var = ((v - mu) ** 2).mean(-1, keepdims=True)
        return (v - mu) / jnp.sqrt(var + EPS)

    def lrelu(v):
        return jnp.where(v > 0, v, NEG_SLOPE * v)

    h = lrelu(rownorm(feats @ params["w_in"] + params["b_in"]))
    for i in range(num_layers - 2):
        res = h
        h = lrelu(rownorm(h @ params["w_hid"][i] + params["b_hid"][i])) + res
    return rownorm(h @ params["w_out"] + params["b_out"])


if __name__ == "__main__":
    # Module config (small, consistent with HeadMLP.__init__ / build):
    B, C, IH, IW = 2, 4, 16, 16        # image: NCHW
    P = 4                              # input_avg_pool_size
    V = 6                              # view_information_num_filters
    NUM_LAYERS = 3                     # -> 1 residual hidden block
    HID = 32                           # num_hidden_filters
    # num_output_filters is unused by the forward pass (output layer uses HID).

    key = jax.random.PRNGKey(0)
    ks = jax.random.split(key, 8)
    image = jax.random.normal(ks[0], (B, C, IH, IW), jnp.float32)
    view_info = jax.random.normal(ks[1], (B, V), jnp.float32)

    f_in = C * P * P + V
    num_hidden = NUM_LAYERS - 2
    scale = 0.1
    params = dict(
        w_in=scale * jax.random.normal(ks[2], (f_in, HID), jnp.float32),
        b_in=scale * jax.random.normal(ks[3], (1, HID), jnp.float32),
        w_hid=scale * jax.random.normal(ks[4], (num_hidden, HID, HID), jnp.float32),
        b_hid=scale * jax.random.normal(ks[5], (num_hidden, 1, HID), jnp.float32),
        w_out=scale * jax.random.normal(ks[6], (HID, HID), jnp.float32),
        b_out=scale * jax.random.normal(ks[7], (1, HID), jnp.float32),
    )

    ref = head_mlp_reference(image, view_info, params,
                             pool_size=P, num_layers=NUM_LAYERS)

    # f32-operand path: bit-tight vs the f32 reference.
    out_f32 = head_mlp_forward(image, view_info, params, pool_size=P,
                               num_layers=NUM_LAYERS, matmul_dtype=jnp.float32)
    out_f32 = jax.block_until_ready(out_f32)
    assert out_f32.shape == (B, HID), out_f32.shape
    err32 = float(jnp.max(jnp.abs(out_f32 - ref)))
    assert jnp.allclose(out_f32, ref, atol=1e-3, rtol=1e-3), err32

    # bf16-operand path (default; MXU-native on v6e/v7x): relaxed tolerance,
    # as flagged in the review's correctness concerns.
    out_bf16 = head_mlp_forward(image, view_info, params, pool_size=P,
                                num_layers=NUM_LAYERS, matmul_dtype=jnp.bfloat16)
    out_bf16 = jax.block_until_ready(out_bf16)
    assert out_bf16.shape == (B, HID), out_bf16.shape
    err16 = float(jnp.max(jnp.abs(out_bf16 - ref)))
    assert jnp.allclose(out_bf16, ref, atol=1e-1, rtol=5e-2), err16

    print("KERNEL_OK")
</pallas_src>

<mosaic_0001>
module attributes {stable_mosaic.version = 11 : i64} {
  func.func @_head_mlp_kernel(%arg0: i32, %arg1: memref<8x1024xf32, #tpu.memory_space<vmem>>, %arg2: memref<8x6xf32, #tpu.memory_space<vmem>>, %arg3: memref<1024x128xf32, #tpu.memory_space<vmem>>, %arg4: memref<6x128xf32, #tpu.memory_space<vmem>>, %arg5: memref<1x128xf32, #tpu.memory_space<vmem>>, %arg6: memref<1x128x128xf32, #tpu.memory_space<vmem>>, %arg7: memref<1x1x128xf32, #tpu.memory_space<vmem>>, %arg8: memref<128x128xf32, #tpu.memory_space<vmem>>, %arg9: memref<1x128xf32, #tpu.memory_space<vmem>>, %arg10: memref<8x128xf32, #tpu.memory_space<vmem>>) attributes {dimension_semantics = [#tpu.dimension_semantics<parallel>], iteration_bounds = array<i64: 1>, scalar_prefetch = 0 : i64, scratch_operands = 0 : i64, tpu.core_type = #tpu.core_type<tc>, window_params = [{transform_indices = @transform_0, window_bounds = array<i64: 8, 1024>}, {transform_indices = @transform_1, window_bounds = array<i64: 8, 6>}, {pipeline_mode = #tpu.pipeline_mode<synchronous>, transform_indices = @transform_2, window_bounds = array<i64: 1024, 128>}, {pipeline_mode = #tpu.pipeline_mode<synchronous>, transform_indices = @transform_3, window_bounds = array<i64: 6, 128>}, {pipeline_mode = #tpu.pipeline_mode<synchronous>, transform_indices = @transform_4, window_bounds = array<i64: 1, 128>}, {pipeline_mode = #tpu.pipeline_mode<synchronous>, transform_indices = @transform_5, window_bounds = array<i64: 1, 128, 128>}, {pipeline_mode = #tpu.pipeline_mode<synchronous>, transform_indices = @transform_6, window_bounds = array<i64: 1, 1, 128>}, {pipeline_mode = #tpu.pipeline_mode<synchronous>, transform_indices = @transform_7, window_bounds = array<i64: 128, 128>}, {pipeline_mode = #tpu.pipeline_mode<synchronous>, transform_indices = @transform_8, window_bounds = array<i64: 1, 128>}, {transform_indices = @transform_9, window_bounds = array<i64: 8, 128>}]} {
    %0 = tpu.iota {dimensions = array<i32: 1>} : vector<1x128xi32>
    %c32_i32 = arith.constant 32 : i32
    %1 = vector.broadcast %c32_i32 : i32 to vector<1x128xi32>
    %2 = arith.cmpi slt, %0, %1 : vector<1x128xi32>
    %3 = arith.extui %2 : vector<1x128xi1> to vector<1x128xi32>
    %4 = arith.sitofp %3 : vector<1x128xi32> to vector<1x128xf32>
    %c0 = arith.constant 0 : index
    %c0_0 = arith.constant 0 : index
    %5 = vector.load %arg1[%c0, %c0_0] : memref<8x1024xf32, #tpu.memory_space<vmem>>, vector<8x1024xf32>
    %c0_1 = arith.constant 0 : index
    %c0_2 = arith.constant 0 : index
    %6 = vector.load %arg3[%c0_1, %c0_2] : memref<1024x128xf32, #tpu.memory_space<vmem>>, vector<1024x128xf32>
    %cst = arith.constant dense<0.000000e+00> : vector<8x128xf32>
    %7 = tpu.matmul %5, %6, %cst {dimension_numbers = #tpu.dot_dimension_numbers<[1], [0], [0], [1], [0, 0, 1, 1], [], []>} : vector<8x1024xf32>, vector<1024x128xf32>, vector<8x128xf32> -> vector<8x128xf32>
    %c0_3 = arith.constant 0 : index
    %c0_4 = arith.constant 0 : index
    %8 = vector.load %arg2[%c0_3, %c0_4] : memref<8x6xf32, #tpu.memory_space<vmem>>, vector<8x6xf32>
    %c0_5 = arith.constant 0 : index
    %c0_6 = arith.constant 0 : index
    %9 = vector.load %arg4[%c0_5, %c0_6] : memref<6x128xf32, #tpu.memory_space<vmem>>, vector<6x128xf32>
    %cst_7 = arith.constant dense<0.000000e+00> : vector<8x128xf32>
    %10 = tpu.matmul %8, %9, %cst_7 {dimension_numbers = #tpu.dot_dimension_numbers<[1], [0], [0], [1], [0, 0, 1, 1], [], []>} : vector<8x6xf32>, vector<6x128xf32>, vector<8x128xf32> -> vector<8x128xf32>
    %11 = arith.addf %7, %10 : vector<8x128xf32>
    %c0_8 = arith.constant 0 : index
    %c0_9 = arith.constant 0 : index
    %12 = vector.load %arg5[%c0_8, %c0_9] : memref<1x128xf32, #tpu.memory_space<vmem>>, vector<1x128xf32>
    %13 = vector.broadcast %12 : vector<1x128xf32> to vector<8x128xf32>
    %14 = arith.addf %11, %13 : vector<8x128xf32>
    %15 = vector.broadcast %4 : vector<1x128xf32> to vector<8x128xf32>
    %16 = arith.mulf %14, %15 : vector<8x128xf32>
    %cst_10 = arith.constant dense<0.000000e+00> : vector<8xf32>
    %17 = vector.multi_reduction <add>, %16, %cst_10 [1] : vector<8x128xf32> to vector<8xf32>
    %18 = vector.shape_cast %17 : vector<8xf32> to vector<8x1xf32>
    %cst_11 = arith.constant 3.125000e-02 : f32
    %19 = vector.broadcast %cst_11 : f32 to vector<8x1xf32>
    %20 = arith.mulf %18, %19 : vector<8x1xf32>
    %21 = vector.broadcast %20 : vector<8x1xf32> to vector<8x128xf32>
    %22 = arith.subf %14, %21 : vector<8x128xf32>
    %23 = vector.broadcast %4 : vector<1x128xf32> to vector<8x128xf32>
    %24 = arith.mulf %22, %23 : vector<8x128xf32>
    %25 = arith.mulf %24, %24 : vector<8x128xf32>
    %cst_12 = arith.constant dense<0.000000e+00> : vector<8xf32>
    %26 = vector.multi_reduction <add>, %25, %cst_12 [1] : vector<8x128xf32> to vector<8xf32>
    %27 = vector.shape_cast %26 : vector<8xf32> to vector<8x1xf32>
    %cst_13 = arith.constant 3.125000e-02 : f32
    %28 = vector.broadcast %cst_13 : f32 to vector<8x1xf32>
    %29 = arith.mulf %27, %28 : vector<8x1xf32>
    %cst_14 = arith.constant 9.99999974E-6 : f32
    %30 = vector.broadcast %cst_14 : f32 to vector<8x1xf32>
    %31 = arith.addf %29, %30 : vector<8x1xf32>
    %32 = math.rsqrt %31 : vector<8x1xf32>
    %33 = vector.broadcast %32 : vector<8x1xf32> to vector<8x128xf32>
    %34 = arith.mulf %22, %33 : vector<8x128xf32>
    %cst_15 = arith.constant 0.000000e+00 : f32
    %35 = vector.broadcast %cst_15 : f32 to vector<8x128xf32>
    %36 = arith.cmpf ogt, %34, %35 : vector<8x128xf32>
    %cst_16 = arith.constant 0.00999999977 : f32
    %37 = vector.broadcast %cst_16 : f32 to vector<8x128xf32>
    %38 = arith.mulf %37, %34 : vector<8x128xf32>
    %39 = arith.select %36, %34, %38 : vector<8x128xi1>, vector<8x128xf32>
    %c0_17 = arith.constant 0 : index
    %c0_18 = arith.constant 0 : index
    %c0_19 = arith.constant 0 : index
    %40 = vector.load %arg6[%c0_17, %c0_18, %c0_19] : memref<1x128x128xf32, #tpu.memory_space<vmem>>, vector<1x128x128xf32>
    %41 = vector.shape_cast %40 : vector<1x128x128xf32> to vector<128x128xf32>
    %cst_20 = arith.constant dense<0.000000e+00> : vector<8x128xf32>
    %42 = tpu.matmul %39, %41, %cst_20 {dimension_numbers = #tpu.dot_dimension_numbers<[1], [0], [0], [1], [0, 0, 1, 1], [], []>} : vector<8x128xf32>, vector<128x128xf32>, vector<8x128xf32> -> vector<8x128xf32>
    %c0_21 = arith.constant 0 : index
    %c0_22 = arith.constant 0 : index
    %c0_23 = arith.constant 0 : index
    %43 = vector.load %arg7[%c0_21, %c0_22, %c0_23] : memref<1x1x128xf32, #tpu.memory_space<vmem>>, vector<1x1x128xf32>
    %44 = vector.shape_cast %43 : vector<1x1x128xf32> to vector<1x128xf32>
    %45 = vector.broadcast %44 : vector<1x128xf32> to vector<8x128xf32>
    %46 = arith.addf %42, %45 : vector<8x128xf32>
    %47 = vector.broadcast %4 : vector<1x128xf32> to vector<8x128xf32>
    %48 = arith.mulf %46, %47 : vector<8x128xf32>
    %cst_24 = arith.constant dense<0.000000e+00> : vector<8xf32>
    %49 = vector.multi_reduction <add>, %48, %cst_24 [1] : vector<8x128xf32> to vector<8xf32>
    %50 = vector.shape_cast %49 : vector<8xf32> to vector<8x1xf32>
    %cst_25 = arith.constant 3.125000e-02 : f32
    %51 = vector.broadcast %cst_25 : f32 to vector<8x1xf32>
    %52 = arith.mulf %50, %51 : vector<8x1xf32>
    %53 = vector.broadcast %52 : vector<8x1xf32> to vector<8x128xf32>
    %54 = arith.subf %46, %53 : vector<8x128xf32>
    %55 = vector.broadcast %4 : vector<1x128xf32> to vector<8x128xf32>
    %56 = arith.mulf %54, %55 : vector<8x128xf32>
    %57 = arith.mulf %56, %56 : vector<8x128xf32>
    %cst_26 = arith.constant dense<0.000000e+00> : vector<8xf32>
    %58 = vector.multi_reduction <add>, %57, %cst_26 [1] : vector<8x128xf32> to vector<8xf32>
    %59 = vector.shape_cast %58 : vector<8xf32> to vector<8x1xf32>
    %cst_27 = arith.constant 3.125000e-02 : f32
    %60 = vector.broadcast %cst_27 : f32 to vector<8x1xf32>
    %61 = arith.mulf %59, %60 : vector<8x1xf32>
    %cst_28 = arith.constant 9.99999974E-6 : f32
    %62 = vector.broadcast %cst_28 : f32 to vector<8x1xf32>
    %63 = arith.addf %61, %62 : vector<8x1xf32>
    %64 = math.rsqrt %63 : vector<8x1xf32>
    %65 = vector.broadcast %64 : vector<8x1xf32> to vector<8x128xf32>
    %66 = arith.mulf %54, %65 : vector<8x128xf32>
    %cst_29 = arith.constant 0.000000e+00 : f32
    %67 = vector.broadcast %cst_29 : f32 to vector<8x128xf32>
    %68 = arith.cmpf ogt, %66, %67 : vector<8x128xf32>
    %cst_30 = arith.constant 0.00999999977 : f32
    %69 = vector.broadcast %cst_30 : f32 to vector<8x128xf32>
    %70 = arith.mulf %69, %66 : vector<8x128xf32>
    %71 = arith.select %68, %66, %70 : vector<8x128xi1>, vector<8x128xf32>
    %72 = arith.addf %71, %39 : vector<8x128xf32>
    %c0_31 = arith.constant 0 : index
    %c0_32 = arith.constant 0 : index
    %73 = vector.load %arg8[%c0_31, %c0_32] : memref<128x128xf32, #tpu.memory_space<vmem>>, vector<128x128xf32>
    %cst_33 = arith.constant dense<0.000000e+00> : vector<8x128xf32>
    %74 = tpu.matmul %72, %73, %cst_33 {dimension_numbers = #tpu.dot_dimension_numbers<[1], [0], [0], [1], [0, 0, 1, 1], [], []>} : vector<8x128xf32>, vector<128x128xf32>, vector<8x128xf32> -> vector<8x128xf32>
    %c0_34 = arith.constant 0 : index
    %c0_35 = arith.constant 0 : index
    %75 = vector.load %arg9[%c0_34, %c0_35] : memref<1x128xf32, #tpu.memory_space<vmem>>, vector<1x128xf32>
    %76 = vector.broadcast %75 : vector<1x128xf32> to vector<8x128xf32>
    %77 = arith.addf %74, %76 : vector<8x128xf32>
    %78 = vector.broadcast %4 : vector<1x128xf32> to vector<8x128xf32>
    %79 = arith.mulf %77, %78 : vector<8x128xf32>
    %cst_36 = arith.constant dense<0.000000e+00> : vector<8xf32>
    %80 = vector.multi_reduction <add>, %79, %cst_36 [1] : vector<8x128xf32> to vector<8xf32>
    %81 = vector.shape_cast %80 : vector<8xf32> to vector<8x1xf32>
    %cst_37 = arith.constant 3.125000e-02 : f32
    %82 = vector.broadcast %cst_37 : f32 to vector<8x1xf32>
    %83 = arith.mulf %81, %82 : vector<8x1xf32>
    %84 = vector.broadcast %83 : vector<8x1xf32> to vector<8x128xf32>
    %85 = arith.subf %77, %84 : vector<8x128xf32>
    %86 = vector.broadcast %4 : vector<1x128xf32> to vector<8x128xf32>
    %87 = arith.mulf %85, %86 : vector<8x128xf32>
    %88 = arith.mulf %87, %87 : vector<8x128xf32>
    %cst_38 = arith.constant dense<0.000000e+00> : vector<8xf32>
    %89 = vector.multi_reduction <add>, %88, %cst_38 [1] : vector<8x128xf32> to vector<8xf32>
    %90 = vector.shape_cast %89 : vector<8xf32> to vector<8x1xf32>
    %cst_39 = arith.constant 3.125000e-02 : f32
    %91 = vector.broadcast %cst_39 : f32 to vector<8x1xf32>
    %92 = arith.mulf %90, %91 : vector<8x1xf32>
    %cst_40 = arith.constant 9.99999974E-6 : f32
    %93 = vector.broadcast %cst_40 : f32 to vector<8x1xf32>
    %94 = arith.addf %92, %93 : vector<8x1xf32>
    %95 = math.rsqrt %94 : vector<8x1xf32>
    %96 = vector.broadcast %95 : vector<8x1xf32> to vector<8x128xf32>
    %97 = arith.mulf %85, %96 : vector<8x128xf32>
    %c0_41 = arith.constant 0 : index
    %c0_42 = arith.constant 0 : index
    %98 = vector.load %arg10[%c0_41, %c0_42] : memref<8x128xf32, #tpu.memory_space<vmem>>, vector<8x128xf32>
    tpu.vector_store %arg10[%c0_41, %c0_42], %97 {strides = array<i32>} : memref<8x128xf32, #tpu.memory_space<vmem>>, vector<8x128xf32>,
    return
  }
  func.func @transform_0(%arg0: i32) -> (i32, i32) {
    %c0_i32 = arith.constant 0 : i32
    %c0_i32_0 = arith.constant 0 : i32
    return %arg0, %c0_i32 : i32, i32
  }
  func.func @transform_1(%arg0: i32) -> (i32, i32) {
    %c0_i32 = arith.constant 0 : i32
    %c0_i32_0 = arith.constant 0 : i32
    return %arg0, %c0_i32 : i32, i32
  }
  func.func @transform_2(%arg0: i32) -> (i32, i32) {
    %c0_i32 = arith.constant 0 : i32
    %c0_i32_0 = arith.constant 0 : i32
    %c0_i32_1 = arith.constant 0 : i32
    return %c0_i32, %c0_i32_0 : i32, i32
  }
  func.func @transform_3(%arg0: i32) -> (i32, i32) {
    %c0_i32 = arith.constant 0 : i32
    %c0_i32_0 = arith.constant 0 : i32
    %c0_i32_1 = arith.constant 0 : i32
    return %c0_i32, %c0_i32_0 : i32, i32
  }
  func.func @transform_4(%arg0: i32) -> (i32, i32) {
    %c0_i32 = arith.constant 0 : i32
    %c0_i32_0 = arith.constant 0 : i32
    %c0_i32_1 = arith.constant 0 : i32
    return %c0_i32, %c0_i32_0 : i32, i32
  }
  func.func @transform_5(%arg0: i32) -> (i32, i32, i32) {
    %c0_i32 = arith.constant 0 : i32
    %c0_i32_0 = arith.constant 0 : i32
    %c0_i32_1 = arith.constant 0 : i32
    %c0_i32_2 = arith.constant 0 : i32
    return %c0_i32, %c0_i32_0, %c0_i32_1 : i32, i32, i32
  }
  func.func @transform_6(%arg0: i32) -> (i32, i32, i32) {
    %c0_i32 = arith.constant 0 : i32
    %c0_i32_0 = arith.constant 0 : i32
    %c0_i32_1 = arith.constant 0 : i32
    %c0_i32_2 = arith.constant 0 : i32
    return %c0_i32, %c0_i32_0, %c0_i32_1 : i32, i32, i32
  }
  func.func @transform_7(%arg0: i32) -> (i32, i32) {
    %c0_i32 = arith.constant 0 : i32
    %c0_i32_0 = arith.constant 0 : i32
    %c0_i32_1 = arith.constant 0 : i32
    return %c0_i32, %c0_i32_0 : i32, i32
  }
  func.func @transform_8(%arg0: i32) -> (i32, i32) {
    %c0_i32 = arith.constant 0 : i32
    %c0_i32_0 = arith.constant 0 : i32
    %c0_i32_1 = arith.constant 0 : i32
    return %c0_i32, %c0_i32_0 : i32, i32
  }
  func.func @transform_9(%arg0: i32) -> (i32, i32) {
    %c0_i32 = arith.constant 0 : i32
    %c0_i32_0 = arith.constant 0 : i32
    return %arg0, %c0_i32 : i32, i32
  }
}

</mosaic_0001>

<bundles_post_ra>
// kernel: tpu_custom_call.1
= control target key start
LH: loop header
LB: loop body
LE: loop exit
PB: predicated region body
PF: predicated region fallthrough
CT: control target
= control target key end

     0   :  { %14 = vsyncpa [#allocation3], 0  ;;  %s933_s0 = inlined_call_operand.hbm [shape: f32[8,1024], index: 0, kind: input, shape index: {}]   ;;  %s934_s1 = inlined_call_operand.hbm [shape: f32[8,6], index: 1, kind: input, shape index: {}]   ;;  %s935_s2 = inlined_call_operand.hbm [shape: f32[1024,128], index: 2, kind: input, shape index: {}]   ;;  %s936_s3 = inlined_call_operand.hbm [shape: f32[6,128], index: 3, kind: input, shape index: {}]   ;;  %s937_s4 = inlined_call_operand.vmem [shape: f32[1,128], index: 4, kind: input, shape index: {}]   ;;  %s938_s5 = inlined_call_operand.hbm [shape: f32[1,128,128], index: 5, kind: input, shape index: {}]   ;;  %s939_s6 = inlined_call_operand.vmem [shape: f32[1,1,128], index: 6, kind: input, shape index: {}]   ;;  %s940_s7 = inlined_call_operand.hbm [shape: f32[128,128], index: 7, kind: input, shape index: {}]   ;;  %s941_s8 = inlined_call_operand.vmem [shape: f32[1,128], index: 8, kind: input, shape index: {}]   ;;  %s942_s9 = inlined_call_operand.hbm [shape: f32[8,128], index: 9, kind: output, shape index: {}]  }
   0x1   :  { %15 = vsyncpa [#allocation6], 0 }
   0x2   :  { %16 = vsyncpa [#allocation9], 0 }
   0x3   :  { %17 = vsyncpa [#allocation12], 0  ;;  %s35_s11 = sshll.u32 %s934_s1, 4  ;;  %s36_s11 = int_to_ptr.hbm [resolvable:$true] %s35_s11 }
   0x4   :  { %18 = vsyncpa [#allocation4], 0  ;;  %s831_s12 = smov [#allocation5]   ;;  %s59_s16 = sshll.u32 %s936_s3, 4  ;;  %s60_s16 = int_to_ptr.hbm [resolvable:$true] %s59_s16 }
   0x5   :  { %s37_s13 = sshll.u32 %s831_s12, 4  ;;  %s832_s17 = smov [#allocation8]   ;;  %s38_s13 = int_to_ptr.vmem [resolvable:$true] %s37_s13 }
   0x6   :  { %40 = dma.hbm_to_vmem [thread:$0]  %s36_s11, 128, %s38_s13, [#allocation6]  }
   0x7   :  { %s61_s18 = sshll.u32 %s832_s17, 4  ;;  %s24_s21 = sshll.u32 %s933_s0, 4  ;;  %s62_s18 = int_to_ptr.vmem [resolvable:$true] %s61_s18  ;;  %s25_s21 = int_to_ptr.hbm [resolvable:$true] %s24_s21 }
   0x8   :  { %64 = dma.hbm_to_vmem [thread:$0]  %s60_s16, 128, %s62_s18, [#allocation9]  }
   0x9   :  { %s45_s23 = sshll.u32 %s935_s2, 4  ;;  %s833_s24 = smov [#allocation2]   ;;  %s46_s23 = int_to_ptr.hbm [resolvable:$true] %s45_s23 }
   0xa   :  { %s26_s25 = sshll.u32 %s833_s24, 4  ;;  %s834_s3 = smov [#allocation7]   ;;  %s27_s25 = int_to_ptr.vmem [resolvable:$true] %s26_s25 }
   0xb   :  { %29 = dma.hbm_to_vmem [thread:$0]  %s25_s21, 1024, %s27_s25, [#allocation3]  }
   0xc   :  { %s47_s26 = sshll.u32 %s834_s3, 4  ;;  %s835_s27 = smov 128   ;;  %s48_s26 = int_to_ptr.vmem [resolvable:$true] %s47_s26 }
   0xd   :  { %s836_s28 = smov 8   ;;  %s71_s30 = sshll.u32 %s938_s5, 4  ;;  %s72_s30 = int_to_ptr.hbm [resolvable:$true] %s71_s30 }
   0xe   :  { %53 = dma.hbm_to_vmem [thread:$0]  %s46_s23, 16384, %s48_s26, [#allocation6], %s835_s27, %s835_s27, %s836_s28  }
   0xf   :  { %s837_s10 = smov [#allocation10]   ;;  %s86_s13 = sshll.u32 %s940_s7, 4  ;;  %s87_s13 = int_to_ptr.hbm [resolvable:$true] %s86_s13 }
  0x10   :  { %s73_s11 = sshll.u32 %s837_s10, 4  ;;  %s838_s14 = smov [#allocation11]   ;;  %s74_s11 = int_to_ptr.vmem [resolvable:$true] %s73_s11 }
  0x11   :  { %79 = dma.hbm_to_vmem [thread:$0]  %s72_s30, 2048, %s74_s11, [#allocation9], %s835_s27, %s835_s27, %s836_s28  }
  0x12   :  { %s88_s15 = sshll.u32 %s838_s14, 4  ;;  %s89_s15 = int_to_ptr.vmem [resolvable:$true] %s88_s15 }
  0x13   :  { %94 = dma.hbm_to_vmem [thread:$0]  %s87_s13, 2048, %s89_s15, [#allocation12], %s835_s27, %s835_s27, %s836_s28  }
  0x14   :  { %821 = dma.done.wait [#allocation3], 1024  }
  0x15   :  { %822 = vsyncadd [#allocation3], 4294966272 }
  0x16   :  { %823 = dma.done.wait [#allocation6], 16512  }
  0x17   :  { %824 = vsyncadd [#allocation6], 4294950784 }
  0x18   :  { %825 = dma.done.wait [#allocation9], 2176  }
  0x19   :  { %826 = vsyncadd [#allocation9], 4294965120 }
  0x1a   :  { %827 = dma.done.wait [#allocation12], 2048  }
  0x1b   :  { %828 = vsyncadd [#allocation12], 4294965248  ;;  %v149_v0 = vld [vmem:[#allocation7 + $0x78] sm:$0xff]  ;;  %v148_v2 = vld [vmem:[#allocation7 + $0x70] sm:$0xff]  ;;  %vm268_vm0 = vcmask 1045504   ;;  %vm264_vm1 = vcmask 48128  }
  0x1c   :  { %v165_v1 = vld [vmem:[#allocation7 + $0xf8] sm:$0xff]  ;;  %292 = vmatpush.msra.mxu1 %v149_v0  ;;  %v164_v3 = vld [vmem:[#allocation7 + $0xf0] sm:$0xff]  ;;  %v147_v5 = vld [vmem:[#allocation7 + $0x68] sm:$0xff]  ;;  %s618_s21 = sshll.u32 %s942_s9, 4  ;;  %s619_s21 = int_to_ptr.hbm [resolvable:$true] %s618_s21 }
  0x1d   :  { %312 = vmatpush.msra.mxu2 %v165_v1  ;;  %v181_v4 = vld [vmem:[#allocation7 + $0x178] sm:$0xff]  ;;  %v163_v6 = vld [vmem:[#allocation7 + $0xe8] sm:$0xff]  ;;  %v180_v7 = vld [vmem:[#allocation7 + $0x170] sm:$0xff] }
  0x1e   :  { %332 = vmatpush.msra.mxu3 %v181_v4  ;;  %293 = vmatpush.msra.mxu1 %v148_v2  ;;  %v179_v8 = vld [vmem:[#allocation7 + $0x168] sm:$0xff]  ;;  %v146_v9 = vld [vmem:[#allocation7 + $0x60] sm:$0xff]  ;;  %v145_v13 = vld [vmem:[#allocation7 + $0x58] sm:$0xff] }
  0x1f   :  { %313 = vmatpush.msra.mxu2 %v164_v3  ;;  %v162_v10 = vld [vmem:[#allocation7 + $0xe0] sm:$0xff]  ;;  %v161_v14 = vld [vmem:[#allocation7 + $0xd8] sm:$0xff]  ;;  %v196_v17 = vld [vmem:[#allocation7 + $0x1f0] sm:$0xff] }
  0x20   :  { %333 = vmatpush.msra.mxu3 %v180_v7  ;;  %v263_v11 = vld [vmem:[#allocation8] sm:$0x3f]  ;;  %294 = vmatpush.msra.mxu1 %v147_v5  ;;  %v197_v15 = vld [vmem:[#allocation7 + $0x1f8] sm:$0xff]  ;;  %v144_v18 = vld [vmem:[#allocation7 + $0x50] sm:$0xff] }
  0x21   :  { %314 = vmatpush.msra.mxu2 %v163_v6  ;;  %v178_v12 = vld [vmem:[#allocation7 + $0x160] sm:$0xff]  ;;  %632 = vmatpush.msk.msra.mxu0 %vm268_vm0, %v263_v11  ;;  %v177_v16 = vld [vmem:[#allocation7 + $0x158] sm:$0xff]  ;;  %v160_v19 = vld [vmem:[#allocation7 + $0xd0] sm:$0xff] }
  0x22   :  { %334 = vmatpush.msra.mxu3 %v179_v8  ;;  %295 = vmatpush.msra.mxu1 %v146_v9  ;;  %v176_v20 = vld [vmem:[#allocation7 + $0x150] sm:$0xff]  ;;  %v195_v21 = vld [vmem:[#allocation7 + $0x1e8] sm:$0xff]  ;;  %v194_v25 = vld [vmem:[#allocation7 + $0x1e0] sm:$0xff] }
  0x23   :  { %315 = vmatpush.msra.mxu2 %v162_v10  ;;  %352 = vmatpush.msrb.mxu0 %v197_v15  ;;  %v143_v22 = vld [vmem:[#allocation7 + $0x48] sm:$0xff]  ;;  %v142_v26 = vld [vmem:[#allocation7 + $0x40] sm:$0xff]  ;;  %v193_v29 = vld [vmem:[#allocation7 + $0x1d8] sm:$0xff] }
  0x24   :  { %335 = vmatpush.msra.mxu3 %v178_v12  ;;  %296 = vmatpush.msra.mxu1 %v145_v13  ;;  %v159_v23 = vld [vmem:[#allocation7 + $0xc8] sm:$0xff]  ;;  %v158_v27 = vld [vmem:[#allocation7 + $0xc0] sm:$0xff]  ;;  %v141_v30 = vld [vmem:[#allocation7 + $0x38] sm:$0xff] }
  0x25   :  { %316 = vmatpush.msra.mxu2 %v161_v14  ;;  %353 = vmatpush.msrb.mxu0 %v196_v17  ;;  %v175_v24 = vld [vmem:[#allocation7 + $0x148] sm:$0xff]  ;;  %v174_v28 = vld [vmem:[#allocation7 + $0x140] sm:$0xff]  ;;  %v157_v31 = vld [vmem:[#allocation7 + $0xb8] sm:$0xff] }
  0x26   :  { %336 = vmatpush.msra.mxu3 %v177_v16  ;;  %297 = vmatpush.msra.mxu1 %v144_v18  ;;  %v173_v32 = vld [vmem:[#allocation7 + $0x138] sm:$0xff]  ;;  %v192_v33 = vld [vmem:[#allocation7 + $0x1d0] sm:$0xff]  ;;  %v191_v37 = vld [vmem:[#allocation7 + $0x1c8] sm:$0xff] }
  0x27   :  { %317 = vmatpush.msra.mxu2 %v160_v19  ;;  %354 = vmatpush.msrb.mxu0 %v195_v21  ;;  %v140_v34 = vld [vmem:[#allocation7 + $0x30] sm:$0xff]  ;;  %v139_v38 = vld [vmem:[#allocation7 + $0x28] sm:$0xff]  ;;  %v190_v41 = vld [vmem:[#allocation7 + $0x1c0] sm:$0xff] }
  0x28   :  { %337 = vmatpush.msra.mxu3 %v176_v20  ;;  %298 = vmatpush.msra.mxu1 %v143_v22  ;;  %v156_v35 = vld [vmem:[#allocation7 + $0xb0] sm:$0xff]  ;;  %v155_v39 = vld [vmem:[#allocation7 + $0xa8] sm:$0xff]  ;;  %v138_v42 = vld [vmem:[#allocation7 + $0x20] sm:$0xff] }
  0x29   :  { %318 = vmatpush.msra.mxu2 %v159_v23  ;;  %355 = vmatpush.msrb.mxu0 %v194_v25  ;;  %v172_v36 = vld [vmem:[#allocation7 + $0x130] sm:$0xff]  ;;  %v171_v40 = vld [vmem:[#allocation7 + $0x128] sm:$0xff]  ;;  %v154_v43 = vld [vmem:[#allocation7 + $0xa0] sm:$0xff] }
  0x2a   :  { %338 = vmatpush.msra.mxu3 %v175_v24  ;;  %299 = vmatpush.msra.mxu1 %v142_v26  ;;  %v170_v44 = vld [vmem:[#allocation7 + $0x120] sm:$0xff]  ;;  %v189_v45 = vld [vmem:[#allocation7 + $0x1b8] sm:$0xff]  ;;  %v188_v49 = vld [vmem:[#allocation7 + $0x1b0] sm:$0xff] }
  0x2b   :  { %319 = vmatpush.msra.mxu2 %v158_v27  ;;  %356 = vmatpush.msrb.mxu0 %v193_v29  ;;  %v137_v46 = vld [vmem:[#allocation7 + $0x18] sm:$0xff]  ;;  %v136_v50 = vld [vmem:[#allocation7 + $0x10] sm:$0xff]  ;;  %v187_v53 = vld [vmem:[#allocation7 + $0x1a8] sm:$0xff] }
  0x2c   :  { %339 = vmatpush.msra.mxu3 %v174_v28  ;;  %300 = vmatpush.msra.mxu1 %v141_v30  ;;  %v153_v47 = vld [vmem:[#allocation7 + $0x98] sm:$0xff]  ;;  %v152_v51 = vld [vmem:[#allocation7 + $0x90] sm:$0xff]  ;;  %v135_v54 = vld [vmem:[#allocation7 + $0x8] sm:$0xff] }
  0x2d   :  { %320 = vmatpush.msra.mxu2 %v157_v31  ;;  %357 = vmatpush.msrb.mxu0 %v192_v33  ;;  %v169_v48 = vld [vmem:[#allocation7 + $0x118] sm:$0xff]  ;;  %v168_v52 = vld [vmem:[#allocation7 + $0x110] sm:$0xff]  ;;  %v151_v55 = vld [vmem:[#allocation7 + $0x88] sm:$0xff] }
  0x2e   :  { %340 = vmatpush.msra.mxu3 %v173_v32  ;;  %301 = vmatpush.msra.mxu1 %v140_v34  ;;  %v167_v56 = vld [vmem:[#allocation7 + $0x108] sm:$0xff]  ;;  %v186_v57 = vld [vmem:[#allocation7 + $0x1a0] sm:$0xff]  ;;  %v213_v60 = vld [vmem:[#allocation7 + $0x278] sm:$0xff] }
  0x2f   :  { %321 = vmatpush.msra.mxu2 %v156_v35  ;;  %358 = vmatpush.msrb.mxu0 %v191_v37  ;;  %v134_v58 = vld [vmem:[#allocation7] sm:$0xff]  ;;  %v229_v61 = vld [vmem:[#allocation7 + $0x2f8] sm:$0xff]  ;;  %v212_v0 = vld [vmem:[#allocation7 + $0x270] sm:$0xff] }
  0x30   :  { %341 = vmatpush.msra.mxu3 %v172_v36  ;;  %302 = vmatpush.msra.mxu1 %v139_v38  ;;  %v150_v59 = vld [vmem:[#allocation7 + $0x80] sm:$0xff]  ;;  %v185_v63 = vld [vmem:[#allocation7 + $0x198] sm:$0xff]  ;;  %v228_v1 = vld [vmem:[#allocation7 + $0x2f0] sm:$0xff] }
  0x31   :  { %322 = vmatpush.msra.mxu2 %v155_v39  ;;  %359 = vmatpush.msrb.mxu0 %v190_v41  ;;  %v166_v62 = vld [vmem:[#allocation7 + $0x100] sm:$0xff]  ;;  %v245_v2 = vld [vmem:[#allocation7 + $0x378] sm:$0xff]  ;;  %v184_v3 = vld [vmem:[#allocation7 + $0x190] sm:$0xff] }
  0x32   :  { %342 = vmatpush.msra.mxu3 %v171_v40  ;;  %303 = vmatpush.msra.mxu1 %v138_v42  ;;  %v211_v4 = vld [vmem:[#allocation7 + $0x268] sm:$0xff]  ;;  %v244_v6 = vld [vmem:[#allocation7 + $0x370] sm:$0xff]  ;;  %v127_v7 = vld [vmem:[#allocation2 + $0x8] sm:$0xff] }
  0x33   :  { %323 = vmatpush.msra.mxu2 %v154_v43  ;;  %360 = vmatpush.msrb.mxu0 %v189_v45  ;;  %v227_v5 = vld [vmem:[#allocation7 + $0x2e8] sm:$0xff]  ;;  %v210_v8 = vld [vmem:[#allocation7 + $0x260] sm:$0xff]  ;;  %v262_v12 = vld [vmem:[#allocation5] sm:$0xff] }
  0x34   :  { %343 = vmatpush.msra.mxu3 %v170_v44  ;;  %304 = vmatpush.msra.mxu1 %v137_v46  ;;  %v226_v9 = vld [vmem:[#allocation7 + $0x2e0] sm:$0xff]  ;;  %v243_v10 = vld [vmem:[#allocation7 + $0x368] sm:$0xff]  ;;  %v209_v14 = vld [vmem:[#allocation7 + $0x258] sm:$0xff] }
  0x35   :  { %324 = vmatpush.msra.mxu2 %v153_v47  ;;  %361 = vmatpush.msrb.mxu0 %v188_v49  ;;  %v183_v11 = vld [vmem:[#allocation7 + $0x188] sm:$0xff]  ;;  %v225_v15 = vld [vmem:[#allocation7 + $0x2d8] sm:$0xff]  ;;  %v242_v16 = vld [vmem:[#allocation7 + $0x360] sm:$0xff] }
  0x36   :  { %344 = vmatpush.msra.mxu3 %v169_v48  ;;  %305 = vmatpush.msra.mxu1 %v136_v50  ;;  %v128_v13 = vld [vmem:[#allocation2 + $0x10] sm:$0xff]  ;;  %v182_v17 = vld [vmem:[#allocation7 + $0x180] sm:$0xff]  ;;  %v126_v18 = vld [vmem:[#allocation2] sm:$0xff] }
  0x37   :  { %325 = vmatpush.msra.mxu2 %v152_v51  ;;  %362 = vmatpush.msrb.mxu0 %v187_v53  ;;  %v224_v19 = vld [vmem:[#allocation7 + $0x2d0] sm:$0xff]  ;;  %v241_v21 = vld [vmem:[#allocation7 + $0x358] sm:$0xff]  ;;  %v223_v23 = vld [vmem:[#allocation7 + $0x2c8] sm:$0xff] }
  0x38   :  { %345 = vmatpush.msra.mxu3 %v168_v52  ;;  %306 = vmatpush.msra.mxu1 %v135_v54  ;;  %v208_v20 = vld [vmem:[#allocation7 + $0x250] sm:$0xff]  ;;  %v261_v22 = vld [vmem:[#allocation7 + $0x3f8] sm:$0xff]  ;;  %v207_v24 = vld [vmem:[#allocation7 + $0x248] sm:$0xff] }
  0x39   :  { %326 = vmatpush.msra.mxu2 %v151_v55  ;;  %363 = vmatpush.msrb.mxu0 %v186_v57  ;;  %v240_v25 = vld [vmem:[#allocation7 + $0x350] sm:$0xff]  ;;  %v206_v27 = vld [vmem:[#allocation7 + $0x240] sm:$0xff]  ;;  %v239_v29 = vld [vmem:[#allocation7 + $0x348] sm:$0xff] }
  0x3a   :  { %346 = vmatpush.msra.mxu3 %v167_v56  ;;  %307 = vmatpush.msra.mxu1 %v134_v58  ;;  %v260_v26 = vld [vmem:[#allocation7 + $0x3f0] sm:$0xff]  ;;  %v222_v28 = vld [vmem:[#allocation7 + $0x2c0] sm:$0xff]  ;;  %v259_v30 = vld [vmem:[#allocation7 + $0x3e8] sm:$0xff] }
  0x3b   :  { %327 = vmatpush.msra.mxu2 %v150_v59  ;;  %364 = vmatpush.msrb.mxu0 %v185_v63  ;;  %v221_v31 = vld [vmem:[#allocation7 + $0x2b8] sm:$0xff]  ;;  %v129_v32 = vld [vmem:[#allocation2 + $0x18] sm:$0xff]  ;;  %v238_v34 = vld [vmem:[#allocation7 + $0x340] sm:$0xff] }
  0x3c   :  { %372 = vmatpush.msrb.mxu1 %v213_v60  ;;  %347 = vmatpush.msra.mxu3 %v166_v62  ;;  %v205_v33 = vld [vmem:[#allocation7 + $0x238] sm:$0xff]  ;;  %v258_v35 = vld [vmem:[#allocation7 + $0x3e0] sm:$0xff]  ;;  %v204_v36 = vld [vmem:[#allocation7 + $0x230] sm:$0xff] }
  0x3d   :  { %392 = vmatpush.msrb.mxu2 %v229_v61  ;;  %365 = vmatpush.msrb.mxu0 %v184_v3  ;;  %v220_v37 = vld [vmem:[#allocation7 + $0x2b0] sm:$0xff]  ;;  %v237_v38 = vld [vmem:[#allocation7 + $0x338] sm:$0xff]  ;;  %v203_v40 = vld [vmem:[#allocation7 + $0x228] sm:$0xff] }
  0x3e   :  { %373 = vmatpush.msrb.mxu1 %v212_v0  ;;  %412 = vmatpush.msrb.mxu3 %v245_v2  ;;  %v257_v39 = vld [vmem:[#allocation7 + $0x3d8] sm:$0xff]  ;;  %v219_v41 = vld [vmem:[#allocation7 + $0x2a8] sm:$0xff]  ;;  %v236_v42 = vld [vmem:[#allocation7 + $0x330] sm:$0xff] }
  0x3f   :  { %393 = vmatpush.msrb.mxu2 %v228_v1  ;;  %366 = vmatpush.msrb.mxu0 %v183_v11  ;;  %v256_v43 = vld [vmem:[#allocation7 + $0x3d0] sm:$0xff]  ;;  %v202_v44 = vld [vmem:[#allocation7 + $0x220] sm:$0xff]  ;;  %v235_v46 = vld [vmem:[#allocation7 + $0x328] sm:$0xff] }
  0x40   :  { %374 = vmatpush.msrb.mxu1 %v211_v4  ;;  %413 = vmatpush.msrb.mxu3 %v244_v6  ;;  %v218_v45 = vld [vmem:[#allocation7 + $0x2a0] sm:$0xff]  ;;  %v255_v47 = vld [vmem:[#allocation7 + $0x3c8] sm:$0xff]  ;;  %v201_v48 = vld [vmem:[#allocation7 + $0x218] sm:$0xff] }
  0x41   :  { %394 = vmatpush.msrb.mxu2 %v227_v5  ;;  %633 = vmatmul.msk.f32.vlgmr.msra.gmra.mxu0 %vm264_vm1, %v262_v12  ;;  %v217_v49 = vld [vmem:[#allocation7 + $0x298] sm:$0xff]  ;;  %v234_v50 = vld [vmem:[#allocation7 + $0x320] sm:$0xff]  ;;  %v200_v52 = vld [vmem:[#allocation7 + $0x210] sm:$0xff] }
  0x42   :  { %328 = vmatmul.f32.vlgmr.msra.gmra.mxu2 %v127_v7  ;;  %375 = vmatpush.msrb.mxu1 %v210_v8  ;;  %v254_v51 = vld [vmem:[#allocation7 + $0x3c0] sm:$0xff]  ;;  %v216_v53 = vld [vmem:[#allocation7 + $0x290] sm:$0xff]  ;;  %v233_v54 = vld [vmem:[#allocation7 + $0x318] sm:$0xff] }
  0x43   :  { %395 = vmatpush.msrb.mxu2 %v226_v9  ;;  %414 = vmatpush.msrb.mxu3 %v243_v10  ;;  %v253_v55 = vld [vmem:[#allocation7 + $0x3b8] sm:$0xff]  ;;  %v199_v56 = vld [vmem:[#allocation7 + $0x208] sm:$0xff]  ;;  %v232_v58 = vld [vmem:[#allocation7 + $0x310] sm:$0xff] }
  0x44   :  { %348 = vmatmul.f32.vlgmr.msra.gmra.mxu3 %v128_v13  ;;  %376 = vmatpush.msrb.mxu1 %v209_v14  ;;  %v215_v57 = vld [vmem:[#allocation7 + $0x288] sm:$0xff]  ;;  %v252_v59 = vld [vmem:[#allocation7 + $0x3b0] sm:$0xff]  ;;  %v198_v60 = vld [vmem:[#allocation7 + $0x200] sm:$0xff] }
  0x45   :  { %396 = vmatpush.msrb.mxu2 %v225_v15  ;;  %415 = vmatpush.msrb.mxu3 %v242_v16  ;;  %v214_v61 = vld [vmem:[#allocation7 + $0x280] sm:$0xff]  ;;  %v231_v62 = vld [vmem:[#allocation7 + $0x308] sm:$0xff]  ;;  %v130_v0 = vld [vmem:[#allocation2 + $0x20] sm:$0xff] }
  0x46   :  { %367 = vmatpush.msrb.mxu0 %v182_v17  ;;  %308 = vmatmul.f32.vlgmr.msra.gmra.mxu1 %v126_v18  ;;  %v251_v63 = vld [vmem:[#allocation7 + $0x3a8] sm:$0xff]  ;;  %v131_v1 = vld [vmem:[#allocation2 + $0x28] sm:$0xff]  ;;  %v249_v5 = vld [vmem:[#allocation7 + $0x398] sm:$0xff]  ;;  %v121_v18 = vlaneseq }
  0x47   :  { %397 = vmatpush.msrb.mxu2 %v224_v19  ;;  %377 = vmatpush.msrb.mxu1 %v208_v20  ;;  %v230_v2 = vld [vmem:[#allocation7 + $0x300] sm:$0xff]  ;;  %v132_v4 = vld [vmem:[#allocation2 + $0x30] sm:$0xff]  ;;  %v248_v6 = vld [vmem:[#allocation7 + $0x390] sm:$0xff] }
  0x48   :  { %416 = vmatpush.msrb.mxu3 %v241_v21  ;;  %432 = vmatpush.msra.mxu0 %v261_v22  ;;  %v250_v3 = vld [vmem:[#allocation7 + $0x3a0] sm:$0xff]  ;;  %v247_v7 = vld [vmem:[#allocation7 + $0x388] sm:$0xff]  ;;  %v133_v9 = vld [vmem:[#allocation2 + $0x38] sm:$0xff]  ;;  %v122_v22 = vand.u32 127, %v121_v18 }
  0x49   :  { %398 = vmatpush.msrb.mxu2 %v223_v23  ;;  %378 = vmatpush.msrb.mxu1 %v207_v24  ;;  %v246_v8 = vld [vmem:[#allocation7 + $0x380] sm:$0xff]  ;;  %v558_v18 = vld [vmem:[#allocation11 + $0x50] sm:$0xff] }
  0x4a   :  { %417 = vmatpush.msrb.mxu3 %v240_v25  ;;  %433 = vmatpush.msra.mxu0 %v260_v26  ;;  %vm123_vm2 = vcmp.lt.s32.totalorder %v122_v22, 32  ;;  %v554_v22 = vld [vmem:[#allocation11 + $0x30] sm:$0xff] }
  0x4b   :  { %399 = vmatpush.msrb.mxu2 %v222_v28  ;;  %379 = vmatpush.msrb.mxu1 %v206_v27  ;;  %v644_v27 = vld [vmem:[%s937_s4] ss:$0 sm:$0xff] }
  0x4c   :  { %418 = vmatpush.msrb.mxu3 %v239_v29  ;;  %434 = vmatpush.msra.mxu0 %v259_v30  ;;  %v839_v30 = vmov 0.0  }
  0x4d   :  { %400 = vmatpush.msrb.mxu2 %v221_v31  ;;  %368 = vmatmul.f32.vlgmr.msrb.gmra.mxu0 %v129_v32  ;;  %v912_v31 = vsel %vm123_vm2, 1.0, %v839_v30 }
  0x4e   :  { %380 = vmatpush.msrb.mxu1 %v205_v33  ;;  %419 = vmatpush.msrb.mxu3 %v238_v34  ;;  %v497_v34 = vld [vmem:[#allocation10 + $0x78] sm:$0xff] }
  0x4f   :  { %435 = vmatpush.msra.mxu0 %v258_v35  ;;  %401 = vmatpush.msrb.mxu2 %v220_v37  ;;  %v496_v35 = vld [vmem:[#allocation10 + $0x70] sm:$0xff] }
  0x50   :  { %381 = vmatpush.msrb.mxu1 %v204_v36  ;;  %420 = vmatpush.msrb.mxu3 %v237_v38 }
  0x51   :  { %436 = vmatpush.msra.mxu0 %v257_v39  ;;  %402 = vmatpush.msrb.mxu2 %v219_v41  ;;  %v495_v41 = vld [vmem:[#allocation10 + $0x68] sm:$0xff] }
  0x52   :  { %382 = vmatpush.msrb.mxu1 %v203_v40  ;;  %421 = vmatpush.msrb.mxu3 %v236_v42  ;;  %v494_v42 = vld [vmem:[#allocation10 + $0x60] sm:$0xff] }
  0x53   :  { %437 = vmatpush.msra.mxu0 %v256_v43  ;;  %403 = vmatpush.msrb.mxu2 %v218_v45  ;;  %v493_v43 = vld [vmem:[#allocation10 + $0x58] sm:$0xff]  ;;  %v491_v45 = vld [vmem:[#allocation10 + $0x48] sm:$0xff] }
  0x54   :  { %383 = vmatpush.msrb.mxu1 %v202_v44  ;;  %422 = vmatpush.msrb.mxu3 %v235_v46  ;;  %v492_v44 = vld [vmem:[#allocation10 + $0x50] sm:$0xff]  ;;  %v490_v46 = vld [vmem:[#allocation10 + $0x40] sm:$0xff] }
  0x55   :  { %438 = vmatpush.msra.mxu0 %v255_v47  ;;  %404 = vmatpush.msrb.mxu2 %v217_v49  ;;  %v489_v47 = vld [vmem:[#allocation10 + $0x38] sm:$0xff]  ;;  %v487_v49 = vld [vmem:[#allocation10 + $0x28] sm:$0xff] }
  0x56   :  { %384 = vmatpush.msrb.mxu1 %v201_v48  ;;  %423 = vmatpush.msrb.mxu3 %v234_v50  ;;  %v488_v48 = vld [vmem:[#allocation10 + $0x30] sm:$0xff]  ;;  %v486_v50 = vld [vmem:[#allocation10 + $0x20] sm:$0xff] }
  0x57   :  { %439 = vmatpush.msra.mxu0 %v254_v51  ;;  %405 = vmatpush.msrb.mxu2 %v216_v53  ;;  %v485_v51 = vld [vmem:[#allocation10 + $0x18] sm:$0xff]  ;;  %v483_v53 = vld [vmem:[#allocation10 + $0x8] sm:$0xff] }
  0x58   :  { %385 = vmatpush.msrb.mxu1 %v200_v52  ;;  %424 = vmatpush.msrb.mxu3 %v233_v54  ;;  %v484_v52 = vld [vmem:[#allocation10 + $0x10] sm:$0xff]  ;;  %v482_v54 = vld [vmem:[#allocation10] sm:$0xff] }
  0x59   :  { %440 = vmatpush.msra.mxu0 %v253_v55  ;;  %406 = vmatpush.msrb.mxu2 %v215_v57 }
  0x5a   :  { %386 = vmatpush.msrb.mxu1 %v199_v56  ;;  %425 = vmatpush.msrb.mxu3 %v232_v58 }
  0x5b   :  { %441 = vmatpush.msra.mxu0 %v252_v59  ;;  %407 = vmatpush.msrb.mxu2 %v214_v61 }
  0x5c   :  { %387 = vmatpush.msrb.mxu1 %v198_v60  ;;  %426 = vmatpush.msrb.mxu3 %v231_v62 }
  0x5d   :  { %442 = vmatpush.msra.mxu0 %v251_v63  ;;  %388 = vmatmul.f32.vlgmr.msrb.gmra.mxu1 %v130_v0 }
  0x5e   :  { %408 = vmatmul.f32.vlgmr.msrb.gmra.mxu2 %v131_v1  ;;  %427 = vmatpush.msrb.mxu3 %v230_v2 }
  0x5f   :  { %443 = vmatpush.msra.mxu0 %v250_v3  ;;  %428 = vmatmul.f32.vlgmr.msrb.gmra.mxu3 %v132_v4  ;;  %v645_v4 = vld [vmem:[%s939_s6] ss:$0 sm:$0xff] }
  0x60   :  { %502 = vmatpush.msra.mxu1 %v497_v34 }
  0x61   :  { %444 = vmatpush.msra.mxu0 %v249_v5 }
  0x62   :  { %503 = vmatpush.msra.mxu1 %v496_v35 }
  0x63   :  { %445 = vmatpush.msra.mxu0 %v248_v6 }
  0x64   :  { %504 = vmatpush.msra.mxu1 %v495_v41 }
  0x65   :  { %446 = vmatpush.msra.mxu0 %v247_v7 }
  0x66   :  { %505 = vmatpush.msra.mxu1 %v494_v42 }
  0x67   :  { %447 = vmatpush.msra.mxu0 %v246_v8  ;;  %v563_v8 = vld [vmem:[#allocation11 + $0x78] sm:$0xff] }
  0x68   :  { %448 = vmatmul.f32.vlgmr.msra.gmra.mxu0 %v133_v9  ;;  %506 = vmatpush.msra.mxu1 %v493_v43 }
  0x69   :  { %568 = vmatpush.msra.mxu2 %v563_v8 }
  0x6a   :  { %507 = vmatpush.msra.mxu1 %v492_v44  ;;  %v646_v44 = vld [vmem:[%s941_s8] ss:$0 sm:$0xff]  ;;  %s840_s8 = smov [#allocation13]  }
  0x6b   :  { %s616_s18 = sshll.u32 %s840_s8, 4  ;;  %s617_s18 = int_to_ptr.vmem [resolvable:$true] %s616_s18 }
  0x6c   :  { %508 = vmatpush.msra.mxu1 %v491_v45 }
  0x6e   :  { %509 = vmatpush.msra.mxu1 %v490_v46 }
  0x70   :  { %510 = vmatpush.msra.mxu1 %v489_v47 }
  0x72   :  { %511 = vmatpush.msra.mxu1 %v488_v48 }
  0x74   :  { %512 = vmatpush.msra.mxu1 %v487_v49 }
  0x76   :  { %513 = vmatpush.msra.mxu1 %v486_v50 }
  0x78   :  { %514 = vmatpush.msra.mxu1 %v485_v51 }
  0x7a   :  { %515 = vmatpush.msra.mxu1 %v484_v52 }
  0x7c   :  { %516 = vmatpush.msra.mxu1 %v483_v53 }
  0x7e   :  { %517 = vmatpush.msra.mxu1 %v482_v54 }
  0xbe   :  { %v289_v11 = vpop.f32.mrf.mxu0 }
  0xc3   :  { %v309_v10 = vpop.f32.mrf.mxu1 }
  0xc4   :  { %v310_v12 = vadd.f32 %v309_v10, %v289_v11 }
  0xc5   :  { %v329_v13 = vpop.f32.mrf.mxu2 }
  0xc6   :  { %v330_v14 = vadd.f32 %v329_v13, %v310_v12 }
  0xc7   :  { %v349_v15 = vpop.f32.mrf.mxu3 }
  0xc8   :  { %v350_v16 = vadd.f32 %v349_v15, %v330_v14  ;;  %v562_v14 = vld [vmem:[#allocation11 + $0x70] sm:$0xff]  ;;  %v561_v15 = vld [vmem:[#allocation11 + $0x68] sm:$0xff] }
  0xc9   :  { %569 = vmatpush.msra.mxu2 %v562_v14 }
  0xca   :  { %v369_v17 = vpop.f32.mrf.mxu0 }
  0xcb   :  { %v370_v20 = vadd.f32 %v369_v17, %v350_v16  ;;  %570 = vmatpush.msra.mxu2 %v561_v15  ;;  %v560_v16 = vld [vmem:[#allocation11 + $0x60] sm:$0xff]  ;;  %v559_v17 = vld [vmem:[#allocation11 + $0x58] sm:$0xff] }
  0xcd   :  { %571 = vmatpush.msra.mxu2 %v560_v16 }
  0xcf   :  { %572 = vmatpush.msra.mxu2 %v559_v17 }
  0xd1   :  { %573 = vmatpush.msra.mxu2 %v558_v18 }
  0xda   :  { %v389_v19 = vpop.f32.mrf.mxu1 }
  0xdb   :  { %v390_v21 = vadd.f32 %v389_v19, %v370_v20  ;;  %v557_v19 = vld [vmem:[#allocation11 + $0x48] sm:$0xff]  ;;  %v556_v20 = vld [vmem:[#allocation11 + $0x40] sm:$0xff] }
  0xdc   :  { %574 = vmatpush.msra.mxu2 %v557_v19 }
  0xde   :  { %575 = vmatpush.msra.mxu2 %v556_v20 }
  0xe1   :  { %v409_v23 = vpop.f32.mrf.mxu2 }
  0xe2   :  { %v410_v24 = vadd.f32 %v409_v23, %v390_v21  ;;  %v429_v25 = vpop.f32.mrf.mxu3  ;;  %v555_v21 = vld [vmem:[#allocation11 + $0x38] sm:$0xff]  ;;  %v553_v23 = vld [vmem:[#allocation11 + $0x28] sm:$0xff] }
  0xe3   :  { %576 = vmatpush.msra.mxu2 %v555_v21 }
  0xe4   :  { %v430_v26 = vadd.f32 %v429_v25, %v410_v24  ;;  %v552_v24 = vld [vmem:[#allocation11 + $0x20] sm:$0xff]  ;;  %v551_v25 = vld [vmem:[#allocation11 + $0x18] sm:$0xff] }
  0xe5   :  { %v449_v28 = vpop.f32.mrf.mxu0  ;;  %577 = vmatpush.msra.mxu2 %v554_v22 }
  0xe6   :  { %v450_v29 = vadd.f32 %v449_v28, %v430_v26  ;;  %v550_v26 = vld [vmem:[#allocation11 + $0x10] sm:$0xff]  ;;  %v548_v28 = vld [vmem:[#allocation11] sm:$0xff] }
  0xe7   :  { %578 = vmatpush.msra.mxu2 %v553_v23 }
  0xe8   :  { %v456_v32 = vadd.f32 %v644_v27, %v450_v29  ;;  %v549_v27 = vld [vmem:[#allocation11 + $0x8] sm:$0xff] }
  0xe9   :  { %579 = vmatpush.msra.mxu2 %v552_v24 }
  0xea   :  { %v457_v33 = vmul.f32 %v912_v31, %v456_v32 }
  0xeb   :  { %580 = vmatpush.msra.mxu2 %v551_v25 }
  0xec   :  { %458 = vadd.xlane.f32.xlu0 %v457_v33 }
  0xed   :  { %581 = vmatpush.msra.mxu2 %v550_v26 }
  0xef   :  { %582 = vmatpush.msra.mxu2 %v549_v27 }
  0xf1   :  { %583 = vmatpush.msra.mxu2 %v548_v28 }
 0x15f   :  { %v459_v36 = vpop.xlane.xlu0 %458 }
 0x160   :  { %v460_v37 = vmul.f32 0.03125, %v459_v36 }
 0x162   :  { %v461_v38 = vsub.f32 %v456_v32, %v460_v37 }
 0x164   :  { %v462_v39 = vmul.f32 %v912_v31, %v461_v38 }
 0x166   :  { %v463_v40 = vmul.f32 %v462_v39, %v462_v39 }
 0x168   :  { %464 = vadd.xlane.f32.xlu0 %v463_v40 }
 0x1db   :  { %v465_v55 = vpop.xlane.xlu0 %464 }
 0x1dc   :  { %v466_v56 = vmul.f32 0.03125, %v465_v55 }
 0x1de   :  { %v467_v57 = vadd.f32 1e-05, %v466_v56 }
 0x1e0   :  { %647 = vrsqrt.f32 %v467_v57  ;;  %vm474_vm4 = vweird.f32 %v467_v57 }
 0x1e6   :  { %v648_v58 = vpop.eup %647 }
 0x1e7   :  { %v469_v59 = vmul.f32 %v648_v58, %v467_v57  ;;  %vm475_vm3 = vweird.f32 %v648_v58 }
 0x1e8   :  { %vm476_vm5 = vmor %vm474_vm4, %vm475_vm3 }
 0x1e9   :  { %v470_v60 = vmul.f32 %v648_v58, %v469_v59 }
 0x1eb   :  { %v471_v61 = vmul.f32 0.5, %v470_v60 }
 0x1ed   :  { %v472_v62 = vsub.f32 1.5, %v471_v61 }
 0x1ef   :  { %v473_v63 = vmul.f32 %v648_v58, %v472_v62 }
 0x1f1   :  { %v477_v0 = vsel %vm476_vm5, %v648_v58, %v473_v63 }
 0x1f2   :  { %v478_v1 = vmul.f32 %v477_v0, %v461_v38 }
 0x1f4   :  { %vm479_vm6 = vcmp.gt.f32.partialorder %v478_v1, 0.0  ;;  %v480_v2 = vmul.f32 0.01, %v478_v1 }
 0x1f6   :  { %v916_v3 = vsel %vm479_vm6, %v478_v1, %v480_v2 }
 0x1f7   :  { %518 = vmatmul.f32.vlgmr.msra.gmra.mxu1 %v916_v3 }
 0x274   :  { %v519_v5 = vpop.f32.mrf.mxu1 }
 0x275   :  { %v520_v6 = vadd.f32 %v645_v4, %v519_v5 }
 0x277   :  { %v522_v7 = vmul.f32 %v912_v31, %v520_v6 }
 0x279   :  { %523 = vadd.xlane.f32.xlu1 %v522_v7 }
 0x2ec   :  { %v524_v9 = vpop.xlane.xlu1 %523 }
 0x2ed   :  { %v525_v10 = vmul.f32 0.03125, %v524_v9 }
 0x2ef   :  { %v526_v11 = vsub.f32 %v520_v6, %v525_v10 }
 0x2f1   :  { %v527_v12 = vmul.f32 %v912_v31, %v526_v11 }
 0x2f3   :  { %v528_v13 = vmul.f32 %v527_v12, %v527_v12 }
 0x2f5   :  { %529 = vadd.xlane.f32.xlu1 %v528_v13 }
 0x368   :  { %v530_v29 = vpop.xlane.xlu1 %529 }
 0x369   :  { %v531_v30 = vmul.f32 0.03125, %v530_v29 }
 0x36b   :  { %v532_v32 = vadd.f32 1e-05, %v531_v30 }
 0x36d   :  { %649 = vrsqrt.f32 %v532_v32  ;;  %vm539_vm8 = vweird.f32 %v532_v32 }
 0x373   :  { %v650_v33 = vpop.eup %649 }
 0x374   :  { %v534_v34 = vmul.f32 %v650_v33, %v532_v32  ;;  %vm540_vm7 = vweird.f32 %v650_v33 }
 0x375   :  { %vm541_vm9 = vmor %vm539_vm8, %vm540_vm7 }
 0x376   :  { %v535_v35 = vmul.f32 %v650_v33, %v534_v34 }
 0x378   :  { %v536_v36 = vmul.f32 0.5, %v535_v35 }
 0x37a   :  { %v537_v37 = vsub.f32 1.5, %v536_v36 }
 0x37c   :  { %v538_v38 = vmul.f32 %v650_v33, %v537_v37 }
 0x37e   :  { %v542_v39 = vsel %vm541_vm9, %v650_v33, %v538_v38 }
 0x37f   :  { %v543_v40 = vmul.f32 %v542_v39, %v526_v11 }
 0x381   :  { %vm544_vm10 = vcmp.gt.f32.partialorder %v543_v40, 0.0  ;;  %v545_v41 = vmul.f32 0.01, %v543_v40 }
 0x383   :  { %v546_v42 = vsel %vm544_vm10, %v543_v40, %v545_v41 }
 0x384   :  { %v547_v43 = vadd.f32 %v546_v42, %v916_v3 }
 0x386   :  { %584 = vmatmul.f32.vlgmr.msra.gmra.mxu2 %v547_v43 }
 0x409   :  { %v585_v45 = vpop.f32.mrf.mxu2 }
 0x40a   :  { %v586_v46 = vadd.f32 %v646_v44, %v585_v45 }
 0x40c   :  { %v588_v47 = vmul.f32 %v912_v31, %v586_v46 }
 0x40e   :  { %589 = vadd.xlane.f32.xlu2 %v588_v47 }
 0x481   :  { %v590_v48 = vpop.xlane.xlu2 %589 }
 0x482   :  { %v591_v49 = vmul.f32 0.03125, %v590_v48 }
 0x484   :  { %v592_v50 = vsub.f32 %v586_v46, %v591_v49 }
 0x486   :  { %v593_v51 = vmul.f32 %v912_v31, %v592_v50 }
 0x488   :  { %v594_v52 = vmul.f32 %v593_v51, %v593_v51 }
 0x48a   :  { %595 = vadd.xlane.f32.xlu2 %v594_v52 }
 0x4fd   :  { %v596_v53 = vpop.xlane.xlu2 %595 }
 0x4fe   :  { %v597_v54 = vmul.f32 0.03125, %v596_v53 }
 0x500   :  { %v598_v55 = vadd.f32 1e-05, %v597_v54 }
 0x502   :  { %651 = vrsqrt.f32 %v598_v55  ;;  %vm605_vm12 = vweird.f32 %v598_v55 }
 0x508   :  { %v652_v56 = vpop.eup %651 }
 0x509   :  { %v600_v57 = vmul.f32 %v652_v56, %v598_v55  ;;  %vm606_vm11 = vweird.f32 %v652_v56 }
 0x50a   :  { %vm607_vm13 = vmor %vm605_vm12, %vm606_vm11 }
 0x50b   :  { %v601_v58 = vmul.f32 %v652_v56, %v600_v57 }
 0x50d   :  { %v602_v59 = vmul.f32 0.5, %v601_v58 }
 0x50f   :  { %v603_v60 = vsub.f32 1.5, %v602_v59 }
 0x511   :  { %v604_v61 = vmul.f32 %v652_v56, %v603_v60 }
 0x513   :  { %v608_v31 = vsel %vm607_vm13, %v652_v56, %v604_v61 }
 0x514   :  { %v609_v62 = vmul.f32 %v608_v31, %v592_v50 }
 0x516   :  { %610 = vst [vmem:[#allocation13] sm:$0xff] %v609_v62 }
 0x517   :  { %621 = dma.vmem_to_hbm [thread:$0]  %s617_s18, 128, %s619_s21, [#allocation4]  }
 0x518   :  { %829 = dma.done.wait [#allocation4], 128  }
 0x519   :  { %830 = vsyncadd [#allocation4], 4294967168 }
 0x51a   :  { %626 = vsyncpa [#allocation3], 1 }
 0x51b   :  { %627 = vsyncpa [#allocation6], 1 }
 0x51c   :  { %628 = vsyncpa [#allocation9], 1 }
 0x51d   :  { %629 = vsyncpa [#allocation12], 1 }
 0x51e   :  { %630 = vsyncpa [#allocation4], 1 }

</bundles_post_ra>
